<compile_context>
chip_gen: v7x
topology: tpu7x:2x2x1
jax: 0.10.0
libtpu: 0.0.40
codegen_flags: <defaults>
</compile_context>

<pallas_src>
import functools
import math

import jax
import jax.numpy as jnp
from jax import lax
from jax.experimental import pallas as pl
from jax.experimental.pallas import tpu as pltpu


def _round_up(a, m):
    return ((a + m - 1) // m) * m


def _sfr_kernel(xt_ref, w1t_ref, b1_ref, w2t_ref, b2_ref, w3t_ref, b3_ref,
                o_ref, *, group_size, num_groups):
    """One batch tile (batch on lanes): 3 matmuls + ReLUs + grouped softmax.

    All arrays are transposed: activations are (features, tb).  MXU operands
    use the refs' dtype (f32 or bf16); accumulation and all softmax math are
    f32.  The grouped softmax is a full-width masked pass (no slicing on the
    lane axis, no concat) finished with a single unmasked lane-dense store.
    """
    f32 = jnp.float32
    cdt = w1t_ref.dtype                                    # MXU operand dtype

    xt = xt_ref[...]                                       # (in, tb)
    h1 = jnp.dot(w1t_ref[...], xt, preferred_element_type=f32) + b1_ref[...]
    h1 = jnp.maximum(h1, 0.0)                              # (128s, tb)
    h2 = jnp.dot(w2t_ref[...], h1.astype(cdt),
                 preferred_element_type=f32) + b2_ref[...]
    h2 = jnp.maximum(h2, 0.0)                              # (64s, tb)
    y = jnp.dot(w3t_ref[...], h2.astype(cdt),
                preferred_element_type=f32) + b3_ref[...]  # (out_rows, tb)

    C, G = group_size, num_groups
    OP, TB = y.shape
    row = lax.broadcasted_iota(jnp.int32, (OP, TB), 0)
    in_groups = row < (G * C)

    # Pass 1: per-group max of the C-1 softmax logits (tiny sublane-slice
    # reductions, full lane width), broadcast back to the group's rows.
    # TODO(synk): for large G replace the O(G) where-chain with a constant
    # (OP, OP) group-broadcast matmul on the idle MXU.
    m_full = jnp.zeros((OP, TB), f32)
    logit_mask = jnp.zeros((OP, TB), jnp.bool_)
    for g in range(G):
        lo = g * C
        grp = (row >= lo) & (row < lo + C)
        logit_mask = jnp.logical_or(logit_mask, (row >= lo) & (row < lo + C - 1))
        m_g = jnp.max(y[lo:lo + C - 1, :], axis=0, keepdims=True)   # (1, tb)
        m_full = jnp.where(grp, m_g, m_full)

    e = jnp.where(logit_mask, jnp.exp(y - m_full), 0.0)

    # Pass 2: per-group sums of exp, broadcast back.  Init 1.0 outside groups
    # so the approx reciprocal never sees a zero denominator.
    s_full = jnp.ones((OP, TB), f32)
    for g in range(G):
        lo = g * C
        grp = (row >= lo) & (row < lo + C)
        s_g = jnp.sum(e[lo:lo + C - 1, :], axis=0, keepdims=True)
        s_full = jnp.where(grp, s_g, s_full)

    inv = pl.reciprocal(s_full, approx=True)               # EUP slot
    out = jnp.where(logit_mask, e * inv, jnp.where(in_groups, y, 0.0))
    o_ref[...] = out                       # ONE unmasked, lane-dense store


def simple_function_recovery_forward(x, params, out_shape, *, block_b=8192,
                                      compute_dtype=jnp.float32):
    """x: (B, in_size) f32.  Returns (B, *out_shape) f32.

    block_b: batch tile (lane axis, rounded to a multiple of 128).  8192
    amortizes the ~0.35 us per-grid-step overhead while keeping the per-tile
    VMEM footprint (~12 MiB at f32) well inside the 32 MiB scoped limit on
    every generation (v7x has 64 MiB physical, v5e/v6e 128 MiB).
    compute_dtype: dtype of MXU operands.  bf16 is beneficial on ALL
    generations (the MXU is natively bf16 even on v5e); accumulation, ReLU and
    softmax stay f32.  Softmax uses an approximate reciprocal (~1e-3-level
    relative error), so rows sum to 1 only approximately.
    """
    w1, b1, w2, b2, w3, b3 = params
    B, in_size = x.shape
    G, C = out_shape
    out_size = G * C
    assert w3.shape[1] == out_size

    # --- transposed weights; pad fc3 output rows to a sublane multiple of 8 --
    out_rows = _round_up(out_size, 8)
    w1t, w2t, w3t = w1.T, w2.T, w3.T                     # (fan_out, fan_in)
    b1t, b2t, b3t = (b.reshape(-1, 1) for b in (b1, b2, b3))   # (fan_out, 1)
    if out_rows != out_size:
        w3t = jnp.pad(w3t, ((0, out_rows - out_size), (0, 0)))
        b3t = jnp.pad(b3t, ((0, out_rows - out_size), (0, 0)))

    # --- batch tiling: batch is the LANE axis -> tiles are multiples of 128 --
    LANE = 128
    block_b = max(LANE, _round_up(block_b, LANE))
    # Target >= 2 grid steps so ("parallel",) can shard across v7x's two TCs.
    tb = min(block_b, max(LANE, _round_up((B + 1) // 2, LANE)))
    b_pad = _round_up(B, tb)
    if b_pad // tb < 2:
        b_pad = 2 * tb
    grid = (b_pad // tb,)

    # --- dtypes & transposed input: matmul operands in compute_dtype ---------
    x_p = jnp.pad(x, ((0, b_pad - B), (0, 0))) if b_pad != B else x
    x_t = x_p.T.astype(compute_dtype)                     # (in_size, b_pad)
    w1c, w2c, w3c = (w.astype(compute_dtype) for w in (w1t, w2t, w3t))
    b1f, b2f, b3f = (b.astype(jnp.float32) for b in (b1t, b2t, b3t))

    def resident(a):  # weights/biases: constant block index -> stay in VMEM
        return pl.BlockSpec(a.shape, lambda i: (0, 0))

    kernel = functools.partial(_sfr_kernel, group_size=C, num_groups=G)
    y_t = pl.pallas_call(
        kernel,
        out_shape=jax.ShapeDtypeStruct((out_rows, b_pad), jnp.float32),
        grid=grid,
        in_specs=[
            pl.BlockSpec((in_size, tb), lambda i: (0, i)),
            resident(w1c), resident(b1f),
            resident(w2c), resident(b2f),
            resident(w3c), resident(b3f),
        ],
        out_specs=pl.BlockSpec((out_rows, tb), lambda i: (0, i)),
        compiler_params=pltpu.CompilerParams(
            dimension_semantics=("parallel",),        # shards across v7x's 2 TCs
            vmem_limit_bytes=32 * 1024 * 1024),
    )(x_t, w1c, b1f, w2c, b2f, w3c, b3f)

    # Drop sublane/batch padding; transpose back is cheap (~40 B/row) and the
    # `.view(-1, *out_shape)` is plain layout glue.
    return y_t[:out_size, :B].T.reshape(B, G, C)


def init_params(key, in_size, out_size, layer_scale=1):
    """Deterministic PyTorch-Linear-style init (uniform +-1/sqrt(fan_in))."""
    h1 = int(128 * layer_scale)
    h2 = int(64 * layer_scale)
    dims = [(in_size, h1), (h1, h2), (h2, out_size)]
    params = []
    for fan_in, fan_out in dims:
        key, kw, kb = jax.random.split(key, 3)
        bound = 1.0 / math.sqrt(fan_in)
        w = jax.random.uniform(kw, (fan_in, fan_out), jnp.float32, -bound, bound)
        b = jax.random.uniform(kb, (1, fan_out), jnp.float32, -bound, bound)
        params += [w, b]
    return tuple(params)


def reference_forward(x, params, out_shape):
    """Pure-JAX reference matching the PyTorch module exactly."""
    w1, b1, w2, b2, w3, b3 = params
    h1 = jax.nn.relu(x @ w1 + b1)
    h2 = jax.nn.relu(h1 @ w2 + b2)
    y = (h2 @ w3 + b3).reshape(-1, *out_shape)
    enc = jax.nn.softmax(y[:, :, :-1], axis=-1)
    return jnp.concatenate([enc, y[:, :, -1:]], axis=-1)


if __name__ == "__main__":
    key = jax.random.PRNGKey(0)
    B, in_size = 2, 4
    out_shape = (2, 5)            # out_size = 10; softmax over first 4 of each group
    out_size = out_shape[0] * out_shape[1]

    kx, kp = jax.random.split(key)
    x = jax.random.normal(kx, (B, in_size), jnp.float32)
    params = init_params(kp, in_size, out_size, layer_scale=1)
    ref = reference_forward(x, params, out_shape)

    # f32 path (approx reciprocal -> slightly looser than exact-f32 tolerance).
    out = jax.block_until_ready(
        simple_function_recovery_forward(x, params, out_shape))
    assert out.shape == (B, *out_shape)
    assert jnp.allclose(out, ref, atol=1e-3, rtol=1e-3), "f32 mismatch vs reference"

    # bf16 matmul-operand path (full-rate MXU on all generations), f32 accumulation.
    out_bf16 = jax.block_until_ready(
        simple_function_recovery_forward(x, params, out_shape,
                                         compute_dtype=jnp.bfloat16))
    assert jnp.allclose(out_bf16, ref, atol=5e-2, rtol=5e-2), "bf16 mismatch"

    # Exercise the tiled/pipelined path with batch padding (grid of 4 tiles).
    B2 = 1000
    x2 = jax.random.normal(jax.random.PRNGKey(1), (B2, in_size), jnp.float32)
    out2 = jax.block_until_ready(
        simple_function_recovery_forward(x2, params, out_shape, block_b=256))
    ref2 = reference_forward(x2, params, out_shape)
    assert out2.shape == (B2, *out_shape)
    assert jnp.allclose(out2, ref2, atol=1e-3, rtol=1e-3), "tiled mismatch"

    print("KERNEL_OK")
</pallas_src>

<mosaic_0001>
module attributes {stable_mosaic.version = 11 : i64} {
  func.func @_sfr_kernel(%arg0: i32, %arg1: memref<4x128xf32, #tpu.memory_space<vmem>>, %arg2: memref<128x4xf32, #tpu.memory_space<vmem>>, %arg3: memref<128x1xf32, #tpu.memory_space<vmem>>, %arg4: memref<64x128xf32, #tpu.memory_space<vmem>>, %arg5: memref<64x1xf32, #tpu.memory_space<vmem>>, %arg6: memref<16x64xf32, #tpu.memory_space<vmem>>, %arg7: memref<16x1xf32, #tpu.memory_space<vmem>>, %arg8: memref<16x128xf32, #tpu.memory_space<vmem>>) attributes {dimension_semantics = [#tpu.dimension_semantics<parallel>], iteration_bounds = array<i64: 2>, scalar_prefetch = 0 : i64, scratch_operands = 0 : i64, tpu.core_type = #tpu.core_type<tc>, window_params = [{transform_indices = @transform_0, window_bounds = array<i64: 4, 128>}, {pipeline_mode = #tpu.pipeline_mode<synchronous>, transform_indices = @transform_1, window_bounds = array<i64: 128, 4>}, {pipeline_mode = #tpu.pipeline_mode<synchronous>, transform_indices = @transform_2, window_bounds = array<i64: 128, 1>}, {pipeline_mode = #tpu.pipeline_mode<synchronous>, transform_indices = @transform_3, window_bounds = array<i64: 64, 128>}, {pipeline_mode = #tpu.pipeline_mode<synchronous>, transform_indices = @transform_4, window_bounds = array<i64: 64, 1>}, {pipeline_mode = #tpu.pipeline_mode<synchronous>, transform_indices = @transform_5, window_bounds = array<i64: 16, 64>}, {pipeline_mode = #tpu.pipeline_mode<synchronous>, transform_indices = @transform_6, window_bounds = array<i64: 16, 1>}, {transform_indices = @transform_7, window_bounds = array<i64: 16, 128>}]} {
    %c0 = arith.constant 0 : index
    %c0_0 = arith.constant 0 : index
    %0 = vector.load %arg1[%c0, %c0_0] : memref<4x128xf32, #tpu.memory_space<vmem>>, vector<4x128xf32>
    %c0_1 = arith.constant 0 : index
    %c0_2 = arith.constant 0 : index
    %1 = vector.load %arg2[%c0_1, %c0_2] : memref<128x4xf32, #tpu.memory_space<vmem>>, vector<128x4xf32>
    %cst = arith.constant dense<0.000000e+00> : vector<128x128xf32>
    %2 = tpu.matmul %1, %0, %cst {dimension_numbers = #tpu.dot_dimension_numbers<[1], [0], [0], [1], [0, 0, 1, 1], [], []>} : vector<128x4xf32>, vector<4x128xf32>, vector<128x128xf32> -> vector<128x128xf32>
    %c0_3 = arith.constant 0 : index
    %c0_4 = arith.constant 0 : index
    %3 = vector.load %arg3[%c0_3, %c0_4] : memref<128x1xf32, #tpu.memory_space<vmem>>, vector<128x1xf32>
    %4 = vector.broadcast %3 : vector<128x1xf32> to vector<128x128xf32>
    %5 = arith.addf %2, %4 : vector<128x128xf32>
    %cst_5 = arith.constant 0.000000e+00 : f32
    %6 = vector.broadcast %cst_5 : f32 to vector<128x128xf32>
    %7 = arith.maximumf %5, %6 : vector<128x128xf32>
    %c0_6 = arith.constant 0 : index
    %c0_7 = arith.constant 0 : index
    %8 = vector.load %arg4[%c0_6, %c0_7] : memref<64x128xf32, #tpu.memory_space<vmem>>, vector<64x128xf32>
    %cst_8 = arith.constant dense<0.000000e+00> : vector<64x128xf32>
    %9 = tpu.matmul %8, %7, %cst_8 {dimension_numbers = #tpu.dot_dimension_numbers<[1], [0], [0], [1], [0, 0, 1, 1], [], []>} : vector<64x128xf32>, vector<128x128xf32>, vector<64x128xf32> -> vector<64x128xf32>
    %c0_9 = arith.constant 0 : index
    %c0_10 = arith.constant 0 : index
    %10 = vector.load %arg5[%c0_9, %c0_10] : memref<64x1xf32, #tpu.memory_space<vmem>>, vector<64x1xf32>
    %11 = vector.broadcast %10 : vector<64x1xf32> to vector<64x128xf32>
    %12 = arith.addf %9, %11 : vector<64x128xf32>
    %cst_11 = arith.constant 0.000000e+00 : f32
    %13 = vector.broadcast %cst_11 : f32 to vector<64x128xf32>
    %14 = arith.maximumf %12, %13 : vector<64x128xf32>
    %c0_12 = arith.constant 0 : index
    %c0_13 = arith.constant 0 : index
    %15 = vector.load %arg6[%c0_12, %c0_13] : memref<16x64xf32, #tpu.memory_space<vmem>>, vector<16x64xf32>
    %cst_14 = arith.constant dense<0.000000e+00> : vector<16x128xf32>
    %16 = tpu.matmul %15, %14, %cst_14 {dimension_numbers = #tpu.dot_dimension_numbers<[1], [0], [0], [1], [0, 0, 1, 1], [], []>} : vector<16x64xf32>, vector<64x128xf32>, vector<16x128xf32> -> vector<16x128xf32>
    %c0_15 = arith.constant 0 : index
    %c0_16 = arith.constant 0 : index
    %17 = vector.load %arg7[%c0_15, %c0_16] : memref<16x1xf32, #tpu.memory_space<vmem>>, vector<16x1xf32>
    %18 = vector.broadcast %17 : vector<16x1xf32> to vector<16x128xf32>
    %19 = arith.addf %16, %18 : vector<16x128xf32>
    %20 = tpu.iota {dimensions = array<i32: 0>} : vector<16x128xi32>
    %c10_i32 = arith.constant 10 : i32
    %21 = vector.broadcast %c10_i32 : i32 to vector<16x128xi32>
    %22 = arith.cmpi slt, %20, %21 : vector<16x128xi32>
    %cst_17 = arith.constant 0.000000e+00 : f32
    %23 = vector.broadcast %cst_17 : f32 to vector<16x128xf32>
    %false = arith.constant false
    %24 = vector.broadcast %false : i1 to vector<16x128xi1>
    %c0_i32 = arith.constant 0 : i32
    %25 = vector.broadcast %c0_i32 : i32 to vector<16x128xi32>
    %26 = arith.cmpi sge, %20, %25 : vector<16x128xi32>
    %c5_i32 = arith.constant 5 : i32
    %27 = vector.broadcast %c5_i32 : i32 to vector<16x128xi32>
    %28 = arith.cmpi slt, %20, %27 : vector<16x128xi32>
    %29 = arith.andi %26, %28 : vector<16x128xi1>
    %c0_i32_18 = arith.constant 0 : i32
    %30 = vector.broadcast %c0_i32_18 : i32 to vector<16x128xi32>
    %31 = arith.cmpi sge, %20, %30 : vector<16x128xi32>
    %c4_i32 = arith.constant 4 : i32
    %32 = vector.broadcast %c4_i32 : i32 to vector<16x128xi32>
    %33 = arith.cmpi slt, %20, %32 : vector<16x128xi32>
    %34 = arith.andi %31, %33 : vector<16x128xi1>
    %35 = arith.ori %24, %34 : vector<16x128xi1>
    %36 = vector.extract_strided_slice %19 {offsets = [0, 0], sizes = [4, 128], strides = [1, 1]} : vector<16x128xf32> to vector<4x128xf32>
    %cst_19 = arith.constant dense<0xFF800000> : vector<128xf32>
    %37 = vector.multi_reduction <maximumf>, %36, %cst_19 [0] : vector<4x128xf32> to vector<128xf32>
    %38 = vector.shape_cast %37 : vector<128xf32> to vector<1x128xf32>
    %39 = vector.shape_cast %38 : vector<1x128xf32> to vector<1x128xf32>
    %40 = vector.broadcast %39 : vector<1x128xf32> to vector<16x128xf32>
    %41 = arith.select %29, %40, %23 : vector<16x128xi1>, vector<16x128xf32>
    %c5_i32_20 = arith.constant 5 : i32
    %42 = vector.broadcast %c5_i32_20 : i32 to vector<16x128xi32>
    %43 = arith.cmpi sge, %20, %42 : vector<16x128xi32>
    %c10_i32_21 = arith.constant 10 : i32
    %44 = vector.broadcast %c10_i32_21 : i32 to vector<16x128xi32>
    %45 = arith.cmpi slt, %20, %44 : vector<16x128xi32>
    %46 = arith.andi %43, %45 : vector<16x128xi1>
    %c5_i32_22 = arith.constant 5 : i32
    %47 = vector.broadcast %c5_i32_22 : i32 to vector<16x128xi32>
    %48 = arith.cmpi sge, %20, %47 : vector<16x128xi32>
    %c9_i32 = arith.constant 9 : i32
    %49 = vector.broadcast %c9_i32 : i32 to vector<16x128xi32>
    %50 = arith.cmpi slt, %20, %49 : vector<16x128xi32>
    %51 = arith.andi %48, %50 : vector<16x128xi1>
    %52 = arith.ori %35, %51 : vector<16x128xi1>
    %53 = vector.extract_strided_slice %19 {offsets = [5, 0], sizes = [4, 128], strides = [1, 1]} : vector<16x128xf32> to vector<4x128xf32>
    %cst_23 = arith.constant dense<0xFF800000> : vector<128xf32>
    %54 = vector.multi_reduction <maximumf>, %53, %cst_23 [0] : vector<4x128xf32> to vector<128xf32>
    %55 = vector.shape_cast %54 : vector<128xf32> to vector<1x128xf32>
    %56 = vector.shape_cast %55 : vector<1x128xf32> to vector<1x128xf32>
    %57 = vector.broadcast %56 : vector<1x128xf32> to vector<16x128xf32>
    %58 = arith.select %46, %57, %41 : vector<16x128xi1>, vector<16x128xf32>
    %59 = arith.subf %19, %58 : vector<16x128xf32>
    %60 = math.exp %59 : vector<16x128xf32>
    %cst_24 = arith.constant 0.000000e+00 : f32
    %61 = vector.broadcast %cst_24 : f32 to vector<16x128xf32>
    %62 = arith.select %52, %60, %61 : vector<16x128xi1>, vector<16x128xf32>
    %cst_25 = arith.constant 1.000000e+00 : f32
    %63 = vector.broadcast %cst_25 : f32 to vector<16x128xf32>
    %c0_i32_26 = arith.constant 0 : i32
    %64 = vector.broadcast %c0_i32_26 : i32 to vector<16x128xi32>
    %65 = arith.cmpi sge, %20, %64 : vector<16x128xi32>
    %c5_i32_27 = arith.constant 5 : i32
    %66 = vector.broadcast %c5_i32_27 : i32 to vector<16x128xi32>
    %67 = arith.cmpi slt, %20, %66 : vector<16x128xi32>
    %68 = arith.andi %65, %67 : vector<16x128xi1>
    %69 = vector.extract_strided_slice %62 {offsets = [0, 0], sizes = [4, 128], strides = [1, 1]} : vector<16x128xf32> to vector<4x128xf32>
    %cst_28 = arith.constant dense<0.000000e+00> : vector<128xf32>
    %70 = vector.multi_reduction <add>, %69, %cst_28 [0] : vector<4x128xf32> to vector<128xf32>
    %71 = vector.shape_cast %70 : vector<128xf32> to vector<1x128xf32>
    %72 = vector.shape_cast %71 : vector<1x128xf32> to vector<1x128xf32>
    %73 = vector.broadcast %72 : vector<1x128xf32> to vector<16x128xf32>
    %74 = arith.select %68, %73, %63 : vector<16x128xi1>, vector<16x128xf32>
    %c5_i32_29 = arith.constant 5 : i32
    %75 = vector.broadcast %c5_i32_29 : i32 to vector<16x128xi32>
    %76 = arith.cmpi sge, %20, %75 : vector<16x128xi32>
    %c10_i32_30 = arith.constant 10 : i32
    %77 = vector.broadcast %c10_i32_30 : i32 to vector<16x128xi32>
    %78 = arith.cmpi slt, %20, %77 : vector<16x128xi32>
    %79 = arith.andi %76, %78 : vector<16x128xi1>
    %80 = vector.extract_strided_slice %62 {offsets = [5, 0], sizes = [4, 128], strides = [1, 1]} : vector<16x128xf32> to vector<4x128xf32>
    %cst_31 = arith.constant dense<0.000000e+00> : vector<128xf32>
    %81 = vector.multi_reduction <add>, %80, %cst_31 [0] : vector<4x128xf32> to vector<128xf32>
    %82 = vector.shape_cast %81 : vector<128xf32> to vector<1x128xf32>
    %83 = vector.shape_cast %82 : vector<1x128xf32> to vector<1x128xf32>
    %84 = vector.broadcast %83 : vector<1x128xf32> to vector<16x128xf32>
    %85 = arith.select %79, %84, %74 : vector<16x128xi1>, vector<16x128xf32>
    %86 = tpu.reciprocal %85 {approx = true} : vector<16x128xf32> -> vector<16x128xf32>
    %87 = arith.mulf %62, %86 : vector<16x128xf32>
    %cst_32 = arith.constant 0.000000e+00 : f32
    %88 = vector.broadcast %cst_32 : f32 to vector<16x128xf32>
    %89 = arith.select %22, %19, %88 : vector<16x128xi1>, vector<16x128xf32>
    %90 = arith.select %52, %87, %89 : vector<16x128xi1>, vector<16x128xf32>
    %c0_33 = arith.constant 0 : index
    %c0_34 = arith.constant 0 : index
    %91 = vector.load %arg8[%c0_33, %c0_34] : memref<16x128xf32, #tpu.memory_space<vmem>>, vector<16x128xf32>
    tpu.vector_store %arg8[%c0_33, %c0_34], %90 {strides = array<i32>} : memref<16x128xf32, #tpu.memory_space<vmem>>, vector<16x128xf32>,
    return
  }
  func.func @transform_0(%arg0: i32) -> (i32, i32) {
    %c0_i32 = arith.constant 0 : i32
    %c0_i32_0 = arith.constant 0 : i32
    return %c0_i32, %arg0 : i32, i32
  }
  func.func @transform_1(%arg0: i32) -> (i32, i32) {
    %c0_i32 = arith.constant 0 : i32
    %c0_i32_0 = arith.constant 0 : i32
    %c0_i32_1 = arith.constant 0 : i32
    return %c0_i32, %c0_i32_0 : i32, i32
  }
  func.func @transform_2(%arg0: i32) -> (i32, i32) {
    %c0_i32 = arith.constant 0 : i32
    %c0_i32_0 = arith.constant 0 : i32
    %c0_i32_1 = arith.constant 0 : i32
    return %c0_i32, %c0_i32_0 : i32, i32
  }
  func.func @transform_3(%arg0: i32) -> (i32, i32) {
    %c0_i32 = arith.constant 0 : i32
    %c0_i32_0 = arith.constant 0 : i32
    %c0_i32_1 = arith.constant 0 : i32
    return %c0_i32, %c0_i32_0 : i32, i32
  }
  func.func @transform_4(%arg0: i32) -> (i32, i32) {
    %c0_i32 = arith.constant 0 : i32
    %c0_i32_0 = arith.constant 0 : i32
    %c0_i32_1 = arith.constant 0 : i32
    return %c0_i32, %c0_i32_0 : i32, i32
  }
  func.func @transform_5(%arg0: i32) -> (i32, i32) {
    %c0_i32 = arith.constant 0 : i32
    %c0_i32_0 = arith.constant 0 : i32
    %c0_i32_1 = arith.constant 0 : i32
    return %c0_i32, %c0_i32_0 : i32, i32
  }
  func.func @transform_6(%arg0: i32) -> (i32, i32) {
    %c0_i32 = arith.constant 0 : i32
    %c0_i32_0 = arith.constant 0 : i32
    %c0_i32_1 = arith.constant 0 : i32
    return %c0_i32, %c0_i32_0 : i32, i32
  }
  func.func @transform_7(%arg0: i32) -> (i32, i32) {
    %c0_i32 = arith.constant 0 : i32
    %c0_i32_0 = arith.constant 0 : i32
    return %c0_i32, %arg0 : i32, i32
  }
}

</mosaic_0001>

<bundles_post_ra>
// kernel: tpu_custom_call.1
= control target key start
LH: loop header
LB: loop body
LE: loop exit
PB: predicated region body
PF: predicated region fallthrough
CT: control target
= control target key end

     0   :  { %12 = vsyncpa [#allocation3], 0  ;;  %s1721_s0 = inlined_call_operand.vmem [shape: f32[4,256], index: 0, kind: input, shape index: {}]   ;;  %s1722_s1 = inlined_call_operand.vmem [shape: f32[128,4], index: 1, kind: input, shape index: {}]   ;;  %s1723_s2 = inlined_call_operand.vmem [shape: f32[128,1], index: 2, kind: input, shape index: {}]   ;;  %s1724_s3 = inlined_call_operand.vmem [shape: f32[64,128], index: 3, kind: input, shape index: {}]   ;;  %s1725_s4 = inlined_call_operand.vmem [shape: f32[64,1], index: 4, kind: input, shape index: {}]   ;;  %s1726_s5 = inlined_call_operand.vmem [shape: f32[16,64], index: 5, kind: input, shape index: {}]   ;;  %s1727_s6 = inlined_call_operand.vmem [shape: f32[16,1], index: 6, kind: input, shape index: {}]   ;;  %s1728_s7 = inlined_call_operand.hbm [shape: f32[16,256], index: 7, kind: output, shape index: {}]  }
   0x1   :  { %14 = vsyncpa [#allocation3 + $0x1], 0  ;;  %s1410_s24 = smov 0   ;;  %s1412_s25 = smov 0  }
   0x2   :  { %s1414_s26 = smov 0   ;;  %s1416_s27 = smov 0  }
   0x3 LB: > { %s1431_s28 = sadd.s32 4294967295, %s1363_s27   ;;  %s1031_s29 = sadd.s32 4294967294, %s1363_s27   ;;  %s1363_s27 = sphi %s1416_s27, %s1736_s27   ;;  %s1359_s26 = sphi %s1414_s26, %s1735_s26   ;;  %s1355_s25 = sphi %s1412_s25, %s1734_s25   ;;  %s1351_s24 = sphi %s1410_s24, %s1733_s24  }
   0x4   : > { %s1435_s30 = sadd.s32 1, %s1363_s27   ;;  %s179_s8 = sadd.s32 1, %s1359_s26 }
   0x5   : > { %s176_s9 = ssub.s32 %s1363_s27, %s1435_s30  ;;  %p189_p0 = scmp.ne.s32.totalorder %s1359_s26, %s1355_s25 }
   0x6   : > { %p177_p1 = scmp.eq.s32.totalorder %s176_s9, 0  ;;  %p190_p2 = scmp.eq.s32.totalorder %s1431_s28, 1 }
   0x7   : > { %p195_p3 = scmp.ne.s32.totalorder %s1355_s25, %s1351_s24  ;;  %p196_p4 = scmp.eq.s32.totalorder %s1031_s29, 1 }
   0x8   : > { %s1446_s10 = scalar_select %p177_p1, %s1359_s26, %s179_s8  }
   0x9   : > { %p1448_p5 = por %p190_p2, %p189_p0  ;;  %p1452_p6 = por %p196_p4, %p195_p3 }
   0xa   : > { %p1034_p7 = scmp.ge.s32.totalorder %s1363_s27, 1  ;;  %p239_p8 = scmp.lt.s32.totalorder %s1363_s27, 3 }
   0xc   : > { %p240_p9 = pnand %p1034_p7, %p239_p8 }
   0xd   : > { %p270_p10 = scmp.lt.s32.totalorder (!%p240_p9), %s1431_s28, 1  ;;  %v275_v0 = vld [vmem:[%s1722_s1] sm:$0xff] (!%p240_p9)  ;;  %vm387_vm0 = vcmask (!%p240_p9), 31744   ;;  %v1365_v1 = vmov (!%p240_p9), 0   ;;  %vm436_vm1 = vcmask (!%p240_p9), 1043456   ;;  %v293_v3 = vld [vmem:[%s1723_s2 + $0x10] sm:$0xff] (!%p240_p9) }
   0xe   : > { %243 = sbr.rel (%p240_p9) target bundleno = 810 (0x32a), region = 48  ;;  %1113 = vmatprep.mubr.msk.f32.mxu0 (!%p240_p9), %vm387_vm0, %v275_v0  ;;  %1291 = vset.pattern.permute.xlu0 (!%p240_p9), %v1365_v1  ;;  %v291_v2 = vld [vmem:[%s1723_s2] sm:$0xff] (!%p240_p9)  ;;  %v276_v5 = vld [vmem:[%s1722_s1 + $0x8] sm:$0xff] (!%p240_p9)  ;;  %v277_v6 = vld [vmem:[%s1722_s1 + $0x10] sm:$0xff] (!%p240_p9)  ;;  %vm784_vm2 = vcmask (!%p240_p9), 523264   ;;  %vm902_vm3 = vcmask (!%p240_p9), 1040384  }
   0xf   : > { %1292 = vset.pattern.permute.xlu1 (!%p240_p9), %v1365_v1  ;;  %309 = vperm.xlu0 (!%p240_p9), %1291, %v291_v2   ;;  %v292_v7 = vld [vmem:[%s1723_s2 + $0x8] sm:$0xff] (!%p240_p9)  ;;  %v294_v8 = vld [vmem:[%s1723_s2 + $0x18] sm:$0xff] (!%p240_p9)  ;;  %v279_v10 = vld [vmem:[%s1722_s1 + $0x20] sm:$0xff] (!%p240_p9)  ;;  %vm900_vm4 = vcmask (!%p240_p9), 1047557   ;;  %vm932_vm11 = vcmask (!%p240_p9), 1042432   ;;  %s267_s29 = sand.u32 (!%p240_p9), 1, %s1355_s25  }
  0x10   : > { %319 = vperm.xlu1 (!%p240_p9), %1292, %v293_v3   ;;  %v278_v9 = vld [vmem:[%s1722_s1 + $0x18] sm:$0xff] (!%p240_p9)  ;;  %v295_v11 = vld [vmem:[%s1723_s2 + $0x20] sm:$0xff] (!%p240_p9)  ;;  %v296_v12 = vld [vmem:[%s1723_s2 + $0x28] sm:$0xff] (!%p240_p9)  ;;  %s1035_s8 = sshll.u32 (!%p240_p9), %s267_s29, 4  ;;  %s1057_s14 = sshll.u32 (!%p240_p9), %s1431_s28, 7 }
  0x11   : > { %v280_v13 = vld [vmem:[%s1722_s1 + $0x28] sm:$0xff] (!%p240_p9)  ;;  %v281_v14 = vld [vmem:[%s1722_s1 + $0x30] sm:$0xff] (!%p240_p9)  ;;  %v298_v16 = vld [vmem:[%s1723_s2 + $0x38] sm:$0xff] (!%p240_p9)  ;;  %s269_s9 = scalar_lea.vmem (!%p240_p9), [#allocation2], %s1035_s8  ;;  %s1672_s17 = scalar_lea.hbm (!%p240_p9), %s1728_s7, %s1057_s14 }
  0x12   : > { %v297_v15 = vld [vmem:[%s1723_s2 + $0x30] sm:$0xff] (!%p240_p9)  ;;  %v282_v17 = vld [vmem:[%s1722_s1 + $0x38] sm:$0xff] (!%p240_p9)  ;;  %v283_v18 = vld [vmem:[%s1722_s1 + $0x40] sm:$0xff] (!%p240_p9)  ;;  %s969_s13 = sshll.u32 (!%p240_p9), %s269_s9, 4  ;;  %s1667_s13 = int_to_ptr.vmem [resolvable:$true] %s969_s13 }
  0x13   : > { %314 = vperm.xlu0 (!%p240_p9), %1291, %v292_v7   ;;  %v299_v19 = vld [vmem:[%s1723_s2 + $0x40] sm:$0xff] (!%p240_p9)  ;;  %v300_v20 = vld [vmem:[%s1723_s2 + $0x48] sm:$0xff] (!%p240_p9)  ;;  %v285_v22 = vld [vmem:[%s1722_s1 + $0x50] sm:$0xff] (!%p240_p9)  ;;  %s1301_s18 = scalar_lea.vmem (!%p240_p9), %s1667_s13, 256 }
  0x14   : > { %324 = vperm.xlu1 (!%p240_p9), %1292, %v294_v8   ;;  %v284_v21 = vld [vmem:[%s1722_s1 + $0x48] sm:$0xff] (!%p240_p9)  ;;  %v301_v23 = vld [vmem:[%s1723_s2 + $0x50] sm:$0xff] (!%p240_p9)  ;;  %v302_v24 = vld [vmem:[%s1723_s2 + $0x58] sm:$0xff] (!%p240_p9)  ;;  %p1302_p11 = scmp.ne.s32.totalorder (!%p240_p9), %s1667_s13, %s1301_s18 }
  0x15   : > { %s271_s15 = scalar_select %p270_p10, %s1431_s28, 1  ;;  %v286_v25 = vld [vmem:[%s1722_s1 + $0x58] sm:$0xff]  ;;  %v287_v26 = vld [vmem:[%s1722_s1 + $0x60] sm:$0xff]  ;;  %v304_v28 = vld [vmem:[%s1723_s2 + $0x68] sm:$0xff] }
  0x16   : > { %v303_v27 = vld [vmem:[%s1723_s2 + $0x60] sm:$0xff]  ;;  %v288_v29 = vld [vmem:[%s1722_s1 + $0x68] sm:$0xff]  ;;  %v289_v30 = vld [vmem:[%s1722_s1 + $0x70] sm:$0xff]  ;;  %s1680_s28 = scalar_lea.sflag [#allocation3], %s267_s29  ;;  %p1303_p12 = pnand %p1302_p11, %p1448_p5 }
  0x17   : > { %s1036_s16 = sshll.u32 %s271_s15, 2  ;;  %329 = vperm.xlu0 %1291, %v295_v11   ;;  %v305_v31 = vld [vmem:[%s1723_s2 + $0x70] sm:$0xff]  ;;  %v306_v32 = vld [vmem:[%s1723_s2 + $0x78] sm:$0xff]  ;;  %v609_v34 = vld [vmem:[%s1725_s4] sm:$0xff] }
  0x18   : > { %s273_s19 = scalar_lea.vmem %s1721_s0, %s1036_s16  ;;  %334 = vperm.xlu1 %1292, %v296_v12   ;;  %v290_v33 = vld [vmem:[%s1722_s1 + $0x78] sm:$0xff]  ;;  %v610_v35 = vld [vmem:[%s1725_s4 + $0x8] sm:$0xff]  ;;  %v611_v36 = vld [vmem:[%s1725_s4 + $0x10] sm:$0xff]  ;;  %p1304_p13 = pneg %p1303_p12 }
  0x19   : > { %v274_v4 = vld [vmem:[%s273_s19] sm:$0xf]  ;;  %v612_v37 = vld [vmem:[%s1725_s4 + $0x18] sm:$0xff]  ;;  %v614_v39 = vld [vmem:[%s1725_s4 + $0x28] sm:$0xff]  ;;  %s1366_s19 = smov [#allocation2]  }
  0x1a   : > { %1111 = vmatprep.subr.msk.mxu0 %vm436_vm1, %v274_v4  ;;  %v613_v38 = vld [vmem:[%s1725_s4 + $0x20] sm:$0xff]  ;;  %v615_v40 = vld [vmem:[%s1725_s4 + $0x30] sm:$0xff]  ;;  %v616_v41 = vld [vmem:[%s1725_s4 + $0x38] sm:$0xff]  ;;  %s1305_s20 = sshll.u32 %s1366_s19, 4  ;;  %s1306_s20 = int_to_ptr.vmem [resolvable:$false] %s1305_s20 }
  0x1b   : > { %1112 = vmatpush3.msk.msra.mxu0 %vm436_vm1, %v274_v4  ;;  %339 = vperm.xlu0 %1291, %v297_v15   ;;  %v772_v42 = vld [vmem:[%s1727_s6] sm:$0xff]  ;;  %v773_v43 = vld [vmem:[%s1727_s6 + $0x8] sm:$0xff]  ;;  %s1307_s21 = scalar_lea.vmem %s1306_s20, 512  ;;  %p1308_p0 = scmp.lt.s32.totalorder %s1667_s13, %s1306_s20 }
  0x1c   : > { %1114 = vmatmul.mubr.msk.f32.vlgmr.msra.gmra.mrb[0].mxu0 %vm387_vm0, %v276_v5  ;;  %344 = vperm.xlu1 %1292, %v298_v16   ;;  %v601_v44 = vld [vmem:[%s1724_s3] sm:$0xff]  ;;  %p1309_p1 = scmp.lt.s32.totalorder %s1307_s21, %s1301_s18 }
  0x1d   : > { %1116 = vmatprep.mubr.msk.f32.mxu0 %vm387_vm0, %v277_v6  ;;  %1169 = vmatprep.mubr.f32.mxu1 %v601_v44 }
  0x1e   : > { %p1310_p2 = por %p1309_p1, %p1308_p0 }
  0x1f   : > { %349 = vperm.xlu0 %1291, %v299_v19  }
  0x20   : > { %1117 = vmatmul.mubr.msk.f32.gmra.mrb[2].mxu0 %vm387_vm0, %v278_v9  ;;  %354 = vperm.xlu1 %1292, %v300_v20   ;;  %p1311_p3 = pnand %p1310_p2, %p1304_p13 }
  0x21   : > { %1119 = vmatprep.mubr.msk.f32.mxu0 %vm387_vm0, %v279_v10 }
  0x23   : > { %359 = vperm.xlu0 %1291, %v301_v23  }
  0x24   : > { %1120 = vmatmul.mubr.msk.f32.gmra.mrb[4].mxu0 %vm387_vm0, %v280_v13  ;;  %364 = vperm.xlu1 %1292, %v302_v24  }
  0x25   : > { %1122 = vmatprep.mubr.msk.f32.mxu0 %vm387_vm0, %v281_v14 }
  0x27   : > { %369 = vperm.xlu0 %1291, %v303_v27  }
  0x28   : > { %1123 = vmatmul.mubr.msk.f32.gmra.mrb[6].mxu0 %vm387_vm0, %v282_v17  ;;  %374 = vperm.xlu1 %1292, %v304_v28  }
  0x29   : > { %1125 = vmatprep.mubr.msk.f32.mxu0 %vm387_vm0, %v283_v18 }
  0x2b   : > { %379 = vperm.xlu0 %1291, %v305_v31  }
  0x2c   : > { %1126 = vmatmul.mubr.msk.f32.gmra.mrb[8].mxu0 %vm387_vm0, %v284_v21  ;;  %384 = vperm.xlu1 %1292, %v306_v32  }
  0x2d   : > { %1128 = vmatprep.mubr.msk.f32.mxu0 %vm387_vm0, %v285_v22 }
  0x2f   : > { %619 = vperm.xlu0 %1291, %v609_v34  }
  0x30   : > { %1129 = vmatmul.mubr.msk.f32.gmra.mrb[10].mxu0 %vm387_vm0, %v286_v25  ;;  %624 = vperm.xlu1 %1292, %v610_v35  }
  0x31   : > { %1131 = vmatprep.mubr.msk.f32.mxu0 %vm387_vm0, %v287_v26 }
  0x33   : > { %629 = vperm.xlu0 %1291, %v611_v36  }
  0x34   : > { %1132 = vmatmul.mubr.msk.f32.gmra.mrb[12].mxu0 %vm387_vm0, %v288_v29  ;;  %634 = vperm.xlu1 %1292, %v612_v37  }
  0x35   : > { %1134 = vmatprep.mubr.msk.f32.mxu0 %vm387_vm0, %v289_v30 }
  0x37   : > { %639 = vperm.xlu0 %1291, %v613_v38  }
  0x38   : > { %1135 = vmatmul.mubr.msk.f32.gmra.mrb[14].mxu0 %vm387_vm0, %v290_v33  ;;  %644 = vperm.xlu1 %1292, %v614_v39  }
  0x3b   : > { %649 = vperm.xlu0 %1291, %v615_v40  }
  0x3c   : > { %654 = vperm.xlu1 %1292, %v616_v41  }
  0x3f   : > { %776 = vperm.xlu0 %1291, %v772_v42  }
  0x40   : > { %781 = vperm.xlu1 %1292, %v773_v43  }
  0x8e   : > { %v310_v46 = vpop.permute.xlu0 %309 }
  0x8f   : > { %v320_v45 = vpop.permute.xlu1 %319 }
  0x92   : > { %v315_v48 = vpop.permute.xlu0 %314 }
  0x93   : > { %v325_v47 = vpop.permute.xlu1 %324 }
  0x96   : > { %v330_v50 = vpop.permute.xlu0 %329 }
  0x97   : > { %v335_v49 = vpop.permute.xlu1 %334 }
  0x9a   : > { %v340_v59 = vpop.permute.xlu0 %339 }
  0x9b   : > { %v345_v56 = vpop.permute.xlu1 %344 }
  0x9e   : > { %v350_v8 = vpop.permute.xlu0 %349 }
  0x9f   : > { %v355_v5 = vpop.permute.xlu1 %354 }
  0xa2   : > { %v360_v20 = vpop.permute.xlu0 %359 }
  0xa3   : > { %v365_v17 = vpop.permute.xlu1 %364 }
  0xa6   : > { %v370_v33 = vpop.permute.xlu0 %369 }
  0xa7   : > { %v375_v30 = vpop.permute.xlu1 %374 }
  0xab   : > { %v385_v42 = vpop.permute.xlu1 %384 }
  0xef   : > { %v1115_v51 = vpop.f32.mrb[0].mxu0 }
  0xf0   : > { %v512_v52 = vadd.f32 %v1115_v51, %v315_v48  ;;  %v506_v53 = vpop.f32.mrb[1].mxu0 }
  0xf1   : > { %v507_v54 = vadd.f32 %v506_v53, %v310_v46  ;;  %v602_v53 = vld [vmem:[%s1724_s3 + $0x8] sm:$0xff] }
  0xf2   : > { %v586_v55 = vmax.f32 %v512_v52, 0.0 }
  0xf3   : > { %v585_v57 = vmax.f32 %v507_v54, 0.0  ;;  %v1118_v58 = vpop.f32.mrb[2].mxu0  ;;  %v603_v54 = vld [vmem:[%s1724_s3 + $0x10] sm:$0xff] }
  0xf4   : > { %v522_v60 = vadd.f32 %v1118_v58, %v325_v47  ;;  %v516_v61 = vpop.f32.mrb[3].mxu0  ;;  %v607_v58 = vld [vmem:[%s1724_s3 + $0x30] sm:$0xff] }
  0xf5   : > { %v517_v62 = vadd.f32 %v516_v61, %v320_v45  ;;  %v1200_v63 = vpack.c.bf16 %v586_v55, %v585_v57  ;;  %v380_v45 = vpop.permute.xlu0 %379  ;;  %v604_v55 = vld [vmem:[%s1724_s3 + $0x18] sm:$0xff]  ;;  %v606_v57 = vld [vmem:[%s1724_s3 + $0x28] sm:$0xff]  ;;  %v625_v61 = vpop.permute.xlu1 %624 }
  0xf6   : > { %v588_v0 = vmax.f32 %v522_v60, 0.0  ;;  %v770_v60 = vld [vmem:[%s1726_s5] sm:$0xff] }
  0xf7   : > { %v587_v1 = vmax.f32 %v517_v62, 0.0  ;;  %v1121_v2 = vpop.f32.mrb[4].mxu0  ;;  %1201 = vmatprep.subr.bf16.mxu1 %v1200_v63  ;;  %1197 = vmatprep.mubr.msk.f32.mxu0 %vm784_vm2, %v770_v60 }
  0xf8   : > { %v532_v3 = vadd.f32 %v1121_v2, %v335_v49  ;;  %v526_v4 = vpop.f32.mrb[5].mxu0  ;;  %1203 = vmatpush3.bf16.msra.mxu1 %v1200_v63 }
  0xf9   : > { %v1204_v6 = vpack.c.bf16 %v588_v0, %v587_v1  ;;  %v527_v7 = vadd.f32 %v526_v4, %v330_v50  ;;  %v620_v62 = vpop.permute.xlu0 %619  ;;  %v635_v63 = vpop.permute.xlu1 %634 }
  0xfa   : > { %v590_v9 = vmax.f32 %v532_v3, 0.0 }
  0xfb   : > { %v589_v10 = vmax.f32 %v527_v7, 0.0  ;;  %v1124_v11 = vpop.f32.mrb[6].mxu0  ;;  %1205 = vmatprep.subr.bf16.mxu1 %v1204_v6 }
  0xfc   : > { %v542_v12 = vadd.f32 %v1124_v11, %v345_v56  ;;  %v536_v13 = vpop.f32.mrb[7].mxu0  ;;  %1207 = vmatpush3.bf16.msra.mxu1 %v1204_v6  ;;  %v605_v56 = vld [vmem:[%s1724_s3 + $0x20] sm:$0xff] }
  0xfd   : > { %v1208_v14 = vpack.c.bf16 %v590_v9, %v589_v10  ;;  %v537_v15 = vadd.f32 %v536_v13, %v340_v59  ;;  %v608_v59 = vld [vmem:[%s1724_s3 + $0x38] sm:$0xff]  ;;  %v630_v1 = vpop.permute.xlu0 %629  ;;  %v645_v10 = vpop.permute.xlu1 %644 }
  0xfe   : > { %v592_v16 = vmax.f32 %v542_v12, 0.0 }
  0xff   : > { %v591_v18 = vmax.f32 %v537_v15, 0.0  ;;  %v1127_v19 = vpop.f32.mrb[8].mxu0  ;;  %1209 = vmatprep.subr.bf16.mxu1 %v1208_v14 }
 0x100   : > { %v552_v21 = vadd.f32 %v1127_v19, %v355_v5  ;;  %v546_v22 = vpop.f32.mrb[9].mxu0  ;;  %1211 = vmatpush3.bf16.msra.mxu1 %v1208_v14 }
 0x101   : > { %v1212_v23 = vpack.c.bf16 %v592_v16, %v591_v18  ;;  %v547_v24 = vadd.f32 %v546_v22, %v350_v8  ;;  %v640_v13 = vpop.permute.xlu0 %639  ;;  %v655_v22 = vpop.permute.xlu1 %654 }
 0x102   : > { %v594_v25 = vmax.f32 %v552_v21, 0.0 }
 0x103   : > { %v593_v26 = vmax.f32 %v547_v24, 0.0  ;;  %v1130_v27 = vpop.f32.mrb[10].mxu0  ;;  %1213 = vmatprep.subr.bf16.mxu1 %v1212_v23 }
 0x104   : > { %v562_v28 = vadd.f32 %v1130_v27, %v365_v17  ;;  %v556_v29 = vpop.f32.mrb[11].mxu0  ;;  %1215 = vmatpush3.bf16.msra.mxu1 %v1212_v23 }
 0x105   : > { %v1216_v31 = vpack.c.bf16 %v594_v25, %v593_v26  ;;  %v557_v32 = vadd.f32 %v556_v29, %v360_v20  ;;  %v650_v25 = vpop.permute.xlu0 %649 }
 0x106   : > { %v596_v34 = vmax.f32 %v562_v28, 0.0 }
 0x107   : > { %v595_v35 = vmax.f32 %v557_v32, 0.0  ;;  %v1133_v36 = vpop.f32.mrb[12].mxu0  ;;  %1217 = vmatprep.subr.bf16.mxu1 %v1216_v31 }
 0x108   : > { %v572_v37 = vadd.f32 %v1133_v36, %v375_v30  ;;  %v566_v38 = vpop.f32.mrb[13].mxu0  ;;  %1219 = vmatpush3.bf16.msra.mxu1 %v1216_v31 }
 0x109   : > { %v1220_v39 = vpack.c.bf16 %v596_v34, %v595_v35  ;;  %v567_v40 = vadd.f32 %v566_v38, %v370_v33  ;;  %v771_v33 = vld [vmem:[%s1726_s5 + $0x8] sm:$0xff]  ;;  %v782_v34 = vpop.permute.xlu1 %781  ;;  %v777_v36 = vpop.permute.xlu0 %776 }
 0x10a   : > { %v598_v41 = vmax.f32 %v572_v37, 0.0 }
 0x10b   : > { %v597_v43 = vmax.f32 %v567_v40, 0.0  ;;  %v1136_v44 = vpop.f32.mrb[14].mxu0  ;;  %1221 = vmatprep.subr.bf16.mxu1 %v1220_v39 }
 0x10c   : > { %v582_v46 = vadd.f32 %v1136_v44, %v385_v42  ;;  %v576_v47 = vpop.f32.mrb[15].mxu0  ;;  %1223 = vmatpush3.bf16.msra.mxu1 %v1220_v39 }
 0x10d   : > { %v1224_v48 = vpack.c.bf16 %v598_v41, %v597_v43  ;;  %v577_v49 = vadd.f32 %v576_v47, %v380_v45  ;;  %v866_v45 = vlaneseq }
 0x10e   : > { %v600_v50 = vmax.f32 %v582_v46, 0.0 }
 0x10f   : > { %v599_v51 = vmax.f32 %v577_v49, 0.0  ;;  %1225 = vmatprep.subr.bf16.mxu1 %v1224_v48 }
 0x110   : > { %1227 = vmatpush3.bf16.msra.mxu1 %v1224_v48 }
 0x111   : > { %v1228_v52 = vpack.c.bf16 %v600_v50, %v599_v51  ;;  %v867_v50 = vshrl.u32 %v866_v45, 7 }
 0x113   : > { %1229 = vmatprep.subr.bf16.mxu1 %v1228_v52  ;;  %vm873_vm5 = vcmp.lt.s32.totalorder %v867_v50, 5  ;;  %vm890_vm6 = vcmp.ge.s32.totalorder %v867_v50, 5  ;;  %vm877_vm8 = vcmp.lt.s32.totalorder %v867_v50, 4 }
 0x114   : > { %1231 = vmatpush3.bf16.msra.mxu1 %v1228_v52  ;;  %vm1653_vm9 = vmor %vm877_vm8, %vm890_vm6 }
 0x117   : > { %1170 = vmatmul.mubr.f32.vlgmr.msra.gmra.mrb[0].mxu1 %v602_v53 }
 0x118   : > { %1172 = vmatprep.mubr.f32.mxu1 %v603_v54 }
 0x11b   : > { %1173 = vmatmul.mubr.f32.gmra.mrb[2].mxu1 %v604_v55  ;;  %v868_v55 = vadd.s32 8, %v867_v50 }
 0x11c   : > { %1175 = vmatprep.mubr.f32.mxu1 %v605_v56 }
 0x11d   : > { %vm870_vm7 = vcmp.lt.s32.totalorder %v868_v55, 10  ;;  %vm895_vm10 = vcmp.lt.s32.totalorder %v868_v55, 9 }
 0x11f   : > { %1176 = vmatmul.mubr.f32.gmra.mrb[4].mxu1 %v606_v57 }
 0x120   : > { %1178 = vmatprep.mubr.f32.mxu1 %v607_v58 }
 0x123   : > { %1179 = vmatmul.mubr.f32.gmra.mrb[6].mxu1 %v608_v59 }
 0x1ea   : > { %v1171_v0 = vpop.f32.mrb[0].mxu1 }
 0x1eb   : > { %v729_v2 = vadd.f32 %v1171_v0, %v625_v61  ;;  %v723_v3 = vpop.f32.mrb[1].mxu1 }
 0x1ec   : > { %v724_v4 = vadd.f32 %v723_v3, %v620_v62 }
 0x1ed   : > { %v763_v5 = vmax.f32 %v729_v2, 0.0 }
 0x1ee   : > { %v762_v6 = vmax.f32 %v724_v4, 0.0  ;;  %v1174_v7 = vpop.f32.mrb[2].mxu1 }
 0x1ef   : > { %v739_v8 = vadd.f32 %v1174_v7, %v635_v63  ;;  %v733_v9 = vpop.f32.mrb[3].mxu1 }
 0x1f0   : > { %v1232_v11 = vpack.c.bf16 %v763_v5, %v762_v6  ;;  %v734_v12 = vadd.f32 %v733_v9, %v630_v1 }
 0x1f1   : > { %v765_v14 = vmax.f32 %v739_v8, 0.0 }
 0x1f2   : > { %v764_v15 = vmax.f32 %v734_v12, 0.0  ;;  %v1177_v16 = vpop.f32.mrb[4].mxu1  ;;  %1233 = vmatprep.subr.bf16.mxu0 %v1232_v11 }
 0x1f3   : > { %v749_v17 = vadd.f32 %v1177_v16, %v645_v10  ;;  %v743_v18 = vpop.f32.mrb[5].mxu1  ;;  %1235 = vmatpush3.bf16.msra.mxu0 %v1232_v11 }
 0x1f4   : > { %v1236_v19 = vpack.c.bf16 %v765_v14, %v764_v15  ;;  %v744_v20 = vadd.f32 %v743_v18, %v640_v13 }
 0x1f5   : > { %v767_v21 = vmax.f32 %v749_v17, 0.0 }
 0x1f6   : > { %v766_v23 = vmax.f32 %v744_v20, 0.0  ;;  %v1180_v24 = vpop.f32.mrb[6].mxu1  ;;  %1237 = vmatprep.subr.bf16.mxu0 %v1236_v19 }
 0x1f7   : > { %v759_v26 = vadd.f32 %v1180_v24, %v655_v22  ;;  %v753_v27 = vpop.f32.mrb[7].mxu1  ;;  %1239 = vmatpush3.bf16.msra.mxu0 %v1236_v19 }
 0x1f8   : > { %v1240_v28 = vpack.c.bf16 %v767_v21, %v766_v23  ;;  %v754_v29 = vadd.f32 %v753_v27, %v650_v25 }
 0x1f9   : > { %v769_v30 = vmax.f32 %v759_v26, 0.0 }
 0x1fa   : > { %v768_v31 = vmax.f32 %v754_v29, 0.0  ;;  %1241 = vmatprep.subr.bf16.mxu0 %v1240_v28 }
 0x1fb   : > { %1243 = vmatpush3.bf16.msra.mxu0 %v1240_v28 }
 0x1fc   : > { %v1244_v32 = vpack.c.bf16 %v769_v30, %v768_v31 }
 0x1fe   : > { %1245 = vmatprep.subr.bf16.mxu0 %v1244_v32 }
 0x1ff   : > { %1247 = vmatpush3.bf16.msra.mxu0 %v1244_v32 }
 0x202   : > { %1198 = vmatmul.mubr.msk.f32.vlgmr.msra.gmra.mrb[16].mxu0 %vm784_vm2, %v771_v33 }
 0x2d5   : > { %v1199_v35 = vpop.f32.mrb[16].mxu0 }
 0x2d6   : > { %v1639_v37 = vadd.f32 %v1199_v35, %v782_v34  ;;  %v857_v38 = vpop.f32.mrb[17].mxu0 }
 0x2d7   : > { %v1641_v39 = vadd.f32 %v857_v38, %v777_v36 }
 0x2d8   : > { %v903_v40 = vsel %vm902_vm3, %v1639_v37, -inf  ;;  %v951_v31 = vsel %vm870_vm7, %v1639_v37, 0.0 }
 0x2d9   : > { %v881_v41 = vsel %vm436_vm1, %v1641_v39, -inf  ;;  %v901_v42 = vsel %vm900_vm4, %v1641_v39, -inf }
 0x2da   : > { %v882_v43 = vrot.slane %v881_v41, 4  ;;  %v904_v44 = vmax.f32 %v901_v42, %v903_v40 }
 0x2dc   : > { %v883_v46 = vmax.f32 %v881_v41, %v882_v43  ;;  %v905_v47 = vrot.slane %v904_v44, 4 }
 0x2de   : > { %v884_v48 = vrot.slane %v883_v46, 2  ;;  %v906_v49 = vmax.f32 %v904_v44, %v905_v47 }
 0x2e0   : > { %v885_v51 = vmax.f32 %v883_v46, %v884_v48  ;;  %v907_v52 = vrot.slane %v906_v49, 2 }
 0x2e2   : > { %v886_v53 = vrot.slane %v885_v51, 1  ;;  %v908_v54 = vmax.f32 %v906_v49, %v907_v52 }
 0x2e4   : > { %v887_v56 = vmax.f32 %v885_v51, %v886_v53  ;;  %v909_v57 = vrot.slane %v908_v54, 1 }
 0x2e6   : > { %v888_v58 = vsel %vm873_vm5, %v887_v56, 0.0  ;;  %v910_v59 = vmax.f32 %v908_v54, %v909_v57 }
 0x2e8   : > { %v911_v60 = vsel %vm890_vm6, %v910_v59, %v888_v58  ;;  %v912_v61 = vsel %vm870_vm7, %v910_v59, 0.0 }
 0x2e9   : > { %v913_v62 = vsub.f32 %v1641_v39, %v911_v60  ;;  %v914_v63 = vsub.f32 %v1639_v37, %v912_v61 }
 0x2eb   : > { %v915_v0 = vmul.f32 1.442695, %v913_v62  ;;  %v917_v1 = vmul.f32 1.442695, %v914_v63 }
 0x2ed   : > { %1293 = vpow2.f32 %v915_v0 }
 0x2ee   : > { %1295 = vpow2.f32 %v917_v1 }
 0x2f7   : > { %v1294_v3 = vpop.eup %1293 }
 0x2f8   : > { %v1296_v4 = vpop.eup %1295  ;;  %v919_v5 = vsel %vm1653_vm9, %v1294_v3, 0.0 }
 0x2f9   : > { %v920_v6 = vsel %vm895_vm10, %v1296_v4, 0.0  ;;  %v921_v7 = vsel %vm436_vm1, %v919_v5, 0.0  ;;  %v933_v8 = vrot.slane %v919_v5, 5 }
 0x2fa   : > { %v922_v9 = vrot.slane %v921_v7, 4  ;;  %v934_v10 = vrot.slane %v920_v6, 5 }
 0x2fc   : > { %v923_v11 = vadd.f32 %v922_v9, %v921_v7  ;;  %v935_v12 = vsel %vm932_vm11, %v933_v8, %v934_v10 }
 0x2fd   : > { %v937_v13 = vsel %vm436_vm1, %v935_v12, 0.0 }
 0x2fe   : > { %v924_v14 = vrot.slane %v923_v11, 2  ;;  %v938_v15 = vrot.slane %v937_v13, 4 }
 0x300   : > { %v925_v16 = vadd.f32 %v924_v14, %v923_v11  ;;  %v939_v17 = vadd.f32 %v938_v15, %v937_v13 }
 0x302   : > { %v926_v18 = vrot.slane %v925_v16, 1  ;;  %v940_v19 = vrot.slane %v939_v17, 2 }
 0x304   : > { %v941_v20 = vadd.f32 %v940_v19, %v939_v17  ;;  %v927_v21 = vadd.f32 %v926_v18, %v925_v16 }
 0x306   : > { %v942_v22 = vrot.slane %v941_v20, 1  ;;  %v928_v24 = vsel %vm873_vm5, %v927_v21, 1.0 }
 0x308   : > { %v943_v23 = vadd.f32 %v942_v22, %v941_v20 }
 0x30a   : > { %v944_v25 = vsel %vm890_vm6, %v943_v23, %v928_v24  ;;  %v945_v26 = vsel %vm870_vm7, %v943_v23, 1.0 }
 0x30b   : > { %1297 = vrcp.f32 %v944_v25 }
 0x30c   : > { %1299 = vrcp.f32 %v945_v26 }
 0x315   : > { %v1298_v27 = vpop.eup %1297 }
 0x316   : > { %v1300_v28 = vpop.eup %1299  ;;  %v948_v29 = vmul.f32 %v1298_v27, %v919_v5 }
 0x317   : > { %v949_v30 = vmul.f32 %v1300_v28, %v920_v6 }
 0x318   : > { %v952_v32 = vsel %vm1653_vm9, %v948_v29, %v1641_v39 }
 0x319   : > { %v953_v33 = vsel %vm895_vm10, %v949_v30, %v951_v31  ;;  %954 = vst [vmem:[%s269_s9] sm:$0xff] %v952_v32 }
 0x31a   : > { %955 = vst [vmem:[%s269_s9 + $0x8] sm:$0xff] %v953_v33 }
 0x31b   : > { %1314 = shalt.err (!%p1311_p3)
}
 0x31c   : > { %s1315_s22 = scalar_lea.hbm %s1672_s17, 256  ;;  %s1319_s8 = scalar_lea.hbm %s1728_s7, 512 }
 0x31d   : > { %p1316_p4 = scmp.ne.s32.totalorder %s1672_s17, %s1315_s22  ;;  %p1320_p9 = scmp.lt.u32.totalorder %s1672_s17, %s1728_s7 }
 0x31e   : > { %p1321_p10 = scmp.lt.u32.totalorder %s1319_s8, %s1315_s22  ;;  %p1323_p12 = scmp.lt.u32.totalorder %s1315_s22, %s1672_s17 }
 0x31f   : > { %p1317_p7 = pnand %p1316_p4, %p1448_p5 }
 0x320   : > { %p1322_p11 = por %p1321_p10, %p1320_p9 }
 0x321   : > { %p1318_p8 = pneg %p1317_p7 }
 0x322   : > { %p1324_p13 = por %p1323_p12, %p1322_p11 }
 0x324   : > { %p1325_p0 = pnand %p1324_p13, %p1318_p8 }
 0x326   : > { %1328 = shalt.err (!%p1325_p0)
}
 0x327   : > { %s1367_s15 = smov 128   ;;  %s1368_s16 = smov 256  }
 0x328   : > { %s1369_s18 = smov 8  }
 0x329   : > { %1248 = dma.vmem_to_hbm [thread:$0]  (%p1448_p5), %s1667_s13, 256, %s1672_s17, %s1680_s28, %s1367_s15, %s1368_s16, %s1369_s18  }
 0x32a PF: > { %p1254_p1 = scmp.ge.s32.totalorder %s1363_s27, 2  ;;  %s984_s19 = sand.u32 1, %s1351_s24  }
 0x32b   : > { %s985_s20 = scalar_lea.sflag [#allocation3], %s984_s19 }
 0x32c   : > { %p1251_p2 = pnand %p1254_p1, %p1452_p6 }
 0x32e   : > { %1346 = dma.done.wait (!%p1251_p2), %s985_s20, 256  }
 0x32f   : > { %1348 = vsyncadd (!%p1251_p2), %s985_s20, 4294967040  ;;  %p17_p3 = scmp.ge.s32.totalorder %s1435_s30, 4   ;;  %s1733_s24 = smov %s1355_s25 }
 0x330   : > { %s1734_s25 = smov %s1359_s26  ;;  %s1735_s26 = smov %s1446_s10 }
 0x331   : > { %s1736_s27 = smov %s1435_s30  ;;  %19 = sbr.rel (!%p17_p3) target bundleno = 3 (0x3), region = 83 }
 0x338   :  { %990 = vsyncpa [#allocation3], 1 }
 0x339   :  { %992 = vsyncpa [#allocation3 + $0x1], 1 }

</bundles_post_ra>
